<compile_context>
chip_gen: v6e
topology: v6e:2x2x1
jax: 0.10.0
libtpu: 0.0.40
codegen_flags: <defaults>
</compile_context>

<pallas_src>
import jax
import jax.numpy as jnp
from jax import lax
from jax.experimental import pallas as pl
from jax.experimental.pallas import tpu as pltpu


def _round_up(x, m):
    return ((x + m - 1) // m) * m


def _pick_tile(m, cap=2048, align=128):
    # Lane-axis tile: multiple of 128, at most `cap`, and sized so that the
    # parallel grid axis has >= 2 steps when possible (v7x megacore).
    half = _round_up(max(1, (m + 1) // 2), align)
    return max(align, min(cap, half))


# ---------------------------------------------------------------------------
# Kernel 1: fused backbone patch-conv (+ReLU) + head 1x1 conv (+ReLU) on the
# TRAIN images. bf16 MXU matmuls, f32 accumulation, lane-dense bf16 (D, TM)
# output block.
# ---------------------------------------------------------------------------

def _train_feat_kernel(x_ref, wbkT_ref, bbk_ref, whfT_ref, bhf_ref, f_ref):
    # x: (Kp, TM) bf16; wbkT: (Cb, Kp) bf16; whfT: (D, Cb) bf16; biases f32.
    h = jnp.dot(wbkT_ref[...], x_ref[...], preferred_element_type=jnp.float32)
    h = jnp.maximum(h + bbk_ref[...], 0.0)                       # (Cb, TM) f32
    f = jnp.dot(whfT_ref[...], h.astype(jnp.bfloat16),
                preferred_element_type=jnp.float32)
    f = jnp.maximum(f + bhf_ref[...], 0.0)                       # (D, TM) f32
    f_ref[...] = f.astype(f_ref.dtype)


def train_features(x, w_bkT, b_bk, w_hfT, b_hf, tile_m):
    Kp, M = x.shape
    Cb = w_bkT.shape[0]
    D = w_hfT.shape[0]
    assert M % tile_m == 0
    return pl.pallas_call(
        _train_feat_kernel,
        out_shape=jax.ShapeDtypeStruct((D, M), jnp.bfloat16),
        grid=(M // tile_m,),
        in_specs=[
            pl.BlockSpec((Kp, tile_m), lambda i: (0, i)),
            pl.BlockSpec((Cb, Kp), lambda i: (0, 0)),
            pl.BlockSpec((Cb, 1), lambda i: (0, 0)),
            pl.BlockSpec((D, Cb), lambda i: (0, 0)),
            pl.BlockSpec((D, 1), lambda i: (0, 0)),
        ],
        out_specs=pl.BlockSpec((D, tile_m), lambda i: (0, i)),
        compiler_params=pltpu.CompilerParams(
            dimension_semantics=("parallel",),
            vmem_limit_bytes=32 * 1024 * 1024),
    )(x, w_bkT, b_bk, w_hfT, b_hf)


# ---------------------------------------------------------------------------
# Kernel 2: filter prediction (one-shot, small). Label-weighted pooling as MXU
# matmuls contracting over the lane (pixel) axis (the q@k^T pattern). Emits a
# packed bf16 (8, D) block [cls_filter; w_bb^T; 0] and an f32 (8, 1) bias
# [0; ltrb_prior + b_bb; 0] via single full-block unmasked stores.
#
# TODO(synk): for very large train sets (many frames / high res) this one-shot
# (D, Mtr_pad)+(8, Mtr_pad) block should be converted into a tiled reduction
# over Mtr with a pl.when-initialized accumulator (v7x has only 64 MiB VMEM).
# ---------------------------------------------------------------------------

def _filter_kernel(trf_ref, auxT_ref, trbb_ref, wenc_ref, wpack8_ref,
                   bpack8_ref, wcT_ref, bias8_ref):
    auxT = auxT_ref[...]                               # (8, Mtr): [lbl; ltrb(4); ones; 0; 0]
    trf = trf_ref[...].astype(jnp.float32)             # (D, Mtr)

    # G[i, j] = sum_m auxT[i, m] * auxT[j, m]  (G[0,5] = sum(lbl), G[1:5,0] = sum(ltrb*lbl))
    G = lax.dot_general(auxT, auxT, (((1,), (1,)), ((), ())),
                        preferred_element_type=jnp.float32)        # (8, 8)
    # P[0, :] = sum_m lbl[m] * feat[:, m]
    P = lax.dot_general(auxT, trf, (((1,), (1,)), ((), ())),
                        preferred_element_type=jnp.float32)        # (8, D)

    inv = 1.0 / (G[0:1, 5:6] + 1e-4)                               # (1, 1)

    # bb encoding of the train boxes (tiny, outside the hot tiled loops).
    bb_enc = jnp.dot(trbb_ref[...], wenc_ref[...],
                     preferred_element_type=jnp.float32)           # (Ntr, D)
    cls = P[0:1, :] * inv + jnp.mean(bb_enc, axis=0, keepdims=True)  # (1, D)

    D = P.shape[1]
    # Assemble the packed (8, D) block with one unmasked full-block store:
    # row 0 = cls filter, rows 1..4 = w_bb^T (prepacked on host), rows 5..7 = 0.
    row = lax.broadcasted_iota(jnp.int32, (8, D), 0)
    wcT = jnp.where(row == 0, jnp.broadcast_to(cls, (8, D)), wpack8_ref[...])
    wcT_ref[...] = wcT.astype(wcT_ref.dtype)                       # bf16, single store

    # bias: rows 1..4 = label-weighted ltrb prior + b_bb, rest 0.
    rcol = lax.broadcasted_iota(jnp.int32, (8, 1), 0)
    prior = jnp.where((rcol >= 1) & (rcol <= 4), G[:, 0:1] * inv, 0.0)
    bias8_ref[...] = prior + bpack8_ref[...]                       # single store


def predict_filter(trf, auxT, trbb, w_enc, w_pack8, b_pack8):
    D, Mtr_pad = trf.shape
    Ntr = trbb.shape[0]
    return pl.pallas_call(
        _filter_kernel,
        out_shape=(jax.ShapeDtypeStruct((8, D), jnp.bfloat16),
                   jax.ShapeDtypeStruct((8, 1), jnp.float32)),
        grid=(1,),
        in_specs=[
            pl.BlockSpec((D, Mtr_pad), lambda i: (0, 0)),
            pl.BlockSpec((8, Mtr_pad), lambda i: (0, 0)),
            pl.BlockSpec((Ntr, 4), lambda i: (0, 0)),
            pl.BlockSpec((4, D), lambda i: (0, 0)),
            pl.BlockSpec((8, D), lambda i: (0, 0)),
            pl.BlockSpec((8, 1), lambda i: (0, 0)),
        ],
        out_specs=(
            pl.BlockSpec((8, D), lambda i: (0, 0)),
            pl.BlockSpec((8, 1), lambda i: (0, 0)),
        ),
        compiler_params=pltpu.CompilerParams(
            vmem_limit_bytes=32 * 1024 * 1024),
    )(trf, auxT, trbb, w_enc, w_pack8, b_pack8)


# ---------------------------------------------------------------------------
# Kernel 3: fused TEST path: patch-conv (+ReLU) + head-feature conv (+ReLU) +
# head application. The (D, TM) test features stay in VMEM/vregs; only the
# lane-dense (8, TM) scores/bbox block is written to HBM.
# ---------------------------------------------------------------------------

def _test_head_kernel(x_ref, wbkT_ref, bbk_ref, whfT_ref, bhf_ref,
                      wcT_ref, bias8_ref, o_ref):
    h = jnp.dot(wbkT_ref[...], x_ref[...], preferred_element_type=jnp.float32)
    h = jnp.maximum(h + bbk_ref[...], 0.0)                       # (Cb, TM) f32
    f = jnp.dot(whfT_ref[...], h.astype(jnp.bfloat16),
                preferred_element_type=jnp.float32)
    f = jnp.maximum(f + bhf_ref[...], 0.0)                       # (D, TM) f32
    out = jnp.dot(wcT_ref[...], f.astype(jnp.bfloat16),
                  preferred_element_type=jnp.float32)            # (8, TM) f32
    o_ref[...] = out + bias8_ref[...]


def test_features_and_head(x, w_bkT, b_bk, w_hfT, b_hf, wcT, bias8, tile_m):
    Kp, M = x.shape
    Cb = w_bkT.shape[0]
    D = w_hfT.shape[0]
    assert M % tile_m == 0
    return pl.pallas_call(
        _test_head_kernel,
        out_shape=jax.ShapeDtypeStruct((8, M), jnp.float32),
        grid=(M // tile_m,),
        in_specs=[
            pl.BlockSpec((Kp, tile_m), lambda i: (0, i)),
            pl.BlockSpec((Cb, Kp), lambda i: (0, 0)),
            pl.BlockSpec((Cb, 1), lambda i: (0, 0)),
            pl.BlockSpec((D, Cb), lambda i: (0, 0)),
            pl.BlockSpec((D, 1), lambda i: (0, 0)),
            pl.BlockSpec((8, D), lambda i: (0, 0)),
            pl.BlockSpec((8, 1), lambda i: (0, 0)),
        ],
        out_specs=pl.BlockSpec((8, tile_m), lambda i: (0, i)),
        compiler_params=pltpu.CompilerParams(
            dimension_semantics=("parallel",),
            vmem_limit_bytes=32 * 1024 * 1024),
    )(x, w_bkT, b_bk, w_hfT, b_hf, wcT, bias8)


# ---------------------------------------------------------------------------
# ToMPnet wrapper (parameter setup + glue reshapes in plain JAX)
# ---------------------------------------------------------------------------

class ToMPnetPallas:
    def __init__(self, key, in_ch=3, patch=4, backbone_ch=32, head_dim=32):
        self.patch = patch
        self.backbone_ch = backbone_ch
        self.head_dim = head_dim
        ks = jax.random.split(key, 4)
        k_in = in_ch * patch * patch
        # backbone: patchify conv (kernel = stride = patch), channels-first bf16
        self.w_bkT = (jax.random.normal(ks[0], (backbone_ch, k_in), jnp.float32)
                      / jnp.sqrt(k_in)).astype(jnp.bfloat16)
        self.b_bk = jnp.zeros((backbone_ch, 1), jnp.float32)
        # head feature extractor: 1x1 conv backbone_ch -> head_dim, bf16
        self.w_hfT = (jax.random.normal(ks[1], (head_dim, backbone_ch), jnp.float32)
                      / jnp.sqrt(backbone_ch)).astype(jnp.bfloat16)
        self.b_hf = jnp.zeros((head_dim, 1), jnp.float32)
        # bbox encoder / regressor (small, f32)
        self.w_enc = jax.random.normal(ks[2], (4, head_dim), jnp.float32) / 2.0
        w_bb = jax.random.normal(ks[3], (head_dim, 4), jnp.float32) / jnp.sqrt(head_dim)
        b_bb = jnp.zeros((4, 1), jnp.float32)
        # host-side prepacked regressor rows consumed by the filter kernel
        self.w_pack8 = jnp.concatenate(
            [jnp.zeros((1, head_dim), jnp.float32), w_bb.T,
             jnp.zeros((3, head_dim), jnp.float32)], axis=0)        # (8, D)
        self.b_pack8 = jnp.concatenate(
            [jnp.zeros((1, 1), jnp.float32), b_bb,
             jnp.zeros((3, 1), jnp.float32)], axis=0)               # (8, 1)

    def _patchify(self, imgs):
        # imgs: (N, 3, H, W) NCHW -> pixels-last patches (3*p*p, N*Hf*Wf) bf16.
        # TODO(synk): fold this transpose into the feature-kernel index_map /
        # an in-kernel DMA so the NCHW image is read from HBM exactly once;
        # the 5-D permutation needed does not lower cleanly in Mosaic today,
        # so XLA still materializes the (half-size, bf16) patchified copy.
        N, C, H, W = imgs.shape
        p = self.patch
        Hf, Wf = H // p, W // p
        x = imgs.reshape(N, C, Hf, p, Wf, p)
        x = jnp.transpose(x, (1, 3, 5, 0, 2, 4)).reshape(C * p * p, N * Hf * Wf)
        return x.astype(jnp.bfloat16), (Hf, Wf)

    def forward(self, train_imgs, test_imgs, train_bb,
                train_label, train_ltrb_target):
        assert train_imgs.ndim == 5 and test_imgs.ndim == 5, 'Expect 5 dimensional inputs'
        n_seq = train_imgs.shape[1]
        n_te = test_imgs.shape[0]

        x_tr, (Hf, Wf) = self._patchify(train_imgs.reshape(-1, *train_imgs.shape[-3:]))
        x_te, _ = self._patchify(test_imgs.reshape(-1, *test_imgs.shape[-3:]))
        Mtr, Mte = x_tr.shape[1], x_te.shape[1]

        # Large lane-axis tiles (mem-bound), but keep >= 2 grid steps when
        # possible so both v7x TensorCores get work on the "parallel" axis.
        t_tr = _pick_tile(Mtr)
        t_te = _pick_tile(Mte)
        Mtr_pad = _round_up(Mtr, t_tr)
        Mte_pad = _round_up(Mte, t_te)

        x_tr = jnp.pad(x_tr, ((0, 0), (0, Mtr_pad - Mtr)))
        x_te = jnp.pad(x_te, ((0, 0), (0, Mte_pad - Mte)))

        # Train features: fused backbone + head-feature pass, (D, Mtr_pad) bf16.
        train_feat = train_features(x_tr, self.w_bkT, self.b_bk,
                                    self.w_hfT, self.b_hf, t_tr)

        # Pack the narrow per-pixel train tensors as lane-dense (8, Mtr_pad):
        # [label; ltrb(4); ones; 0; 0]. Zero-padded pixel columns drop out of
        # the label-weighted pooling matmuls automatically.
        lbl = train_label.reshape(1, -1).astype(jnp.float32)
        ltrb = jnp.transpose(
            train_ltrb_target.reshape(-1, 4, Hf * Wf), (1, 0, 2)
        ).reshape(4, -1).astype(jnp.float32)
        auxT = jnp.concatenate(
            [lbl, ltrb, jnp.ones((1, Mtr), jnp.float32),
             jnp.zeros((2, Mtr), jnp.float32)], axis=0)
        auxT = jnp.pad(auxT, ((0, 0), (0, Mtr_pad - Mtr)))

        trbb = train_bb.reshape(-1, 4).astype(jnp.float32)

        wcT, bias8 = predict_filter(train_feat, auxT, trbb,
                                    self.w_enc, self.w_pack8, self.b_pack8)

        # Test path: features + head application fused (no feature round-trip).
        out8 = test_features_and_head(x_te, self.w_bkT, self.b_bk,
                                      self.w_hfT, self.b_hf,
                                      wcT, bias8, t_te)            # (8, Mte_pad)

        test_scores = out8[0, :Mte].reshape(n_te, n_seq, Hf, Wf)
        bbox_preds = jnp.transpose(
            out8[1:5, :Mte].reshape(4, n_te, n_seq, Hf, Wf), (1, 2, 0, 3, 4))
        return test_scores, bbox_preds


# ---------------------------------------------------------------------------
# Main
# ---------------------------------------------------------------------------

if __name__ == "__main__":
    key = jax.random.PRNGKey(0)
    k1, k2, k3, k4, k5, k6 = jax.random.split(key, 6)

    # Small shapes consistent with ToMPnet.forward (images, sequences, 3, H, W)
    H = W = 16
    patch = 4
    Hf = Wf = H // patch

    train_imgs = jax.random.normal(k1, (2, 1, 3, H, W), jnp.float32)
    test_imgs = jax.random.normal(k2, (1, 1, 3, H, W), jnp.float32)
    train_bb = jnp.abs(jax.random.normal(k3, (2, 1, 4), jnp.float32))
    train_label = jax.random.uniform(k4, (2, 1, Hf, Wf), jnp.float32)
    train_ltrb_target = jax.random.uniform(k5, (2, 1, 4, Hf, Wf), jnp.float32)

    model = ToMPnetPallas(k6, in_ch=3, patch=patch, backbone_ch=32, head_dim=32)

    test_scores, bbox_preds = model.forward(
        train_imgs, test_imgs, train_bb, train_label, train_ltrb_target)

    jax.block_until_ready(test_scores)
    jax.block_until_ready(bbox_preds)

    assert test_scores.shape == (1, 1, Hf, Wf)
    assert bbox_preds.shape == (1, 1, 4, Hf, Wf)
    print("KERNEL_OK")
</pallas_src>

<mosaic_0001>
module attributes {stable_mosaic.version = 11 : i64} {
  func.func @_train_feat_kernel(%arg0: i32, %arg1: memref<48x128xbf16, #tpu.memory_space<vmem>>, %arg2: memref<32x48xbf16, #tpu.memory_space<vmem>>, %arg3: memref<32x1xf32, #tpu.memory_space<vmem>>, %arg4: memref<32x32xbf16, #tpu.memory_space<vmem>>, %arg5: memref<32x1xf32, #tpu.memory_space<vmem>>, %arg6: memref<32x128xbf16, #tpu.memory_space<vmem>>) attributes {dimension_semantics = [#tpu.dimension_semantics<parallel>], iteration_bounds = array<i64: 1>, scalar_prefetch = 0 : i64, scratch_operands = 0 : i64, tpu.core_type = #tpu.core_type<tc>, window_params = [{transform_indices = @transform_0, window_bounds = array<i64: 48, 128>}, {pipeline_mode = #tpu.pipeline_mode<synchronous>, transform_indices = @transform_1, window_bounds = array<i64: 32, 48>}, {pipeline_mode = #tpu.pipeline_mode<synchronous>, transform_indices = @transform_2, window_bounds = array<i64: 32, 1>}, {pipeline_mode = #tpu.pipeline_mode<synchronous>, transform_indices = @transform_3, window_bounds = array<i64: 32, 32>}, {pipeline_mode = #tpu.pipeline_mode<synchronous>, transform_indices = @transform_4, window_bounds = array<i64: 32, 1>}, {transform_indices = @transform_5, window_bounds = array<i64: 32, 128>}]} {
    %c0 = arith.constant 0 : index
    %c0_0 = arith.constant 0 : index
    %0 = vector.load %arg2[%c0, %c0_0] : memref<32x48xbf16, #tpu.memory_space<vmem>>, vector<32x48xbf16>
    %c0_1 = arith.constant 0 : index
    %c0_2 = arith.constant 0 : index
    %1 = vector.load %arg1[%c0_1, %c0_2] : memref<48x128xbf16, #tpu.memory_space<vmem>>, vector<48x128xbf16>
    %cst = arith.constant dense<0.000000e+00> : vector<32x128xf32>
    %2 = tpu.matmul %0, %1, %cst {dimension_numbers = #tpu.dot_dimension_numbers<[1], [0], [0], [1], [0, 0, 1, 1], [], []>} : vector<32x48xbf16>, vector<48x128xbf16>, vector<32x128xf32> -> vector<32x128xf32>
    %c0_3 = arith.constant 0 : index
    %c0_4 = arith.constant 0 : index
    %3 = vector.load %arg3[%c0_3, %c0_4] : memref<32x1xf32, #tpu.memory_space<vmem>>, vector<32x1xf32>
    %4 = vector.broadcast %3 : vector<32x1xf32> to vector<32x128xf32>
    %5 = arith.addf %2, %4 : vector<32x128xf32>
    %cst_5 = arith.constant 0.000000e+00 : f32
    %6 = vector.broadcast %cst_5 : f32 to vector<32x128xf32>
    %7 = arith.maximumf %5, %6 : vector<32x128xf32>
    %c0_6 = arith.constant 0 : index
    %c0_7 = arith.constant 0 : index
    %8 = vector.load %arg4[%c0_6, %c0_7] : memref<32x32xbf16, #tpu.memory_space<vmem>>, vector<32x32xbf16>
    %9 = arith.truncf %7 : vector<32x128xf32> to vector<32x128xbf16>
    %cst_8 = arith.constant dense<0.000000e+00> : vector<32x128xf32>
    %10 = tpu.matmul %8, %9, %cst_8 {dimension_numbers = #tpu.dot_dimension_numbers<[1], [0], [0], [1], [0, 0, 1, 1], [], []>} : vector<32x32xbf16>, vector<32x128xbf16>, vector<32x128xf32> -> vector<32x128xf32>
    %c0_9 = arith.constant 0 : index
    %c0_10 = arith.constant 0 : index
    %11 = vector.load %arg5[%c0_9, %c0_10] : memref<32x1xf32, #tpu.memory_space<vmem>>, vector<32x1xf32>
    %12 = vector.broadcast %11 : vector<32x1xf32> to vector<32x128xf32>
    %13 = arith.addf %10, %12 : vector<32x128xf32>
    %cst_11 = arith.constant 0.000000e+00 : f32
    %14 = vector.broadcast %cst_11 : f32 to vector<32x128xf32>
    %15 = arith.maximumf %13, %14 : vector<32x128xf32>
    %16 = arith.truncf %15 : vector<32x128xf32> to vector<32x128xbf16>
    %c0_12 = arith.constant 0 : index
    %c0_13 = arith.constant 0 : index
    %17 = vector.load %arg6[%c0_12, %c0_13] : memref<32x128xbf16, #tpu.memory_space<vmem>>, vector<32x128xbf16>
    tpu.vector_store %arg6[%c0_12, %c0_13], %16 {strides = array<i32>} : memref<32x128xbf16, #tpu.memory_space<vmem>>, vector<32x128xbf16>,
    return
  }
  func.func @transform_0(%arg0: i32) -> (i32, i32) {
    %c0_i32 = arith.constant 0 : i32
    %c0_i32_0 = arith.constant 0 : i32
    return %c0_i32, %arg0 : i32, i32
  }
  func.func @transform_1(%arg0: i32) -> (i32, i32) {
    %c0_i32 = arith.constant 0 : i32
    %c0_i32_0 = arith.constant 0 : i32
    %c0_i32_1 = arith.constant 0 : i32
    return %c0_i32, %c0_i32_0 : i32, i32
  }
  func.func @transform_2(%arg0: i32) -> (i32, i32) {
    %c0_i32 = arith.constant 0 : i32
    %c0_i32_0 = arith.constant 0 : i32
    %c0_i32_1 = arith.constant 0 : i32
    return %c0_i32, %c0_i32_0 : i32, i32
  }
  func.func @transform_3(%arg0: i32) -> (i32, i32) {
    %c0_i32 = arith.constant 0 : i32
    %c0_i32_0 = arith.constant 0 : i32
    %c0_i32_1 = arith.constant 0 : i32
    return %c0_i32, %c0_i32_0 : i32, i32
  }
  func.func @transform_4(%arg0: i32) -> (i32, i32) {
    %c0_i32 = arith.constant 0 : i32
    %c0_i32_0 = arith.constant 0 : i32
    %c0_i32_1 = arith.constant 0 : i32
    return %c0_i32, %c0_i32_0 : i32, i32
  }
  func.func @transform_5(%arg0: i32) -> (i32, i32) {
    %c0_i32 = arith.constant 0 : i32
    %c0_i32_0 = arith.constant 0 : i32
    return %c0_i32, %arg0 : i32, i32
  }
}

</mosaic_0001>

<bundles_post_ra>
// kernel: tpu_custom_call.1
= control target key start
LH: loop header
LB: loop body
LE: loop exit
PB: predicated region body
PF: predicated region fallthrough
CT: control target
= control target key end

     0   :  { %vm84_vm0 = vcmask 392192   ;;  %v372_v2 = vmov 0   ;;  %s458_s0 = inlined_call_operand.vmem [shape: bf16[48,128], index: 0, kind: input, shape index: {}]   ;;  %s459_s1 = inlined_call_operand.vmem [shape: bf16[32,48], index: 1, kind: input, shape index: {}]   ;;  %s460_s2 = inlined_call_operand.vmem [shape: f32[32,1], index: 2, kind: input, shape index: {}]   ;;  %s461_s3 = inlined_call_operand.vmem [shape: bf16[32,32], index: 3, kind: input, shape index: {}]   ;;  %s462_s4 = inlined_call_operand.vmem [shape: f32[32,1], index: 4, kind: input, shape index: {}]   ;;  %s463_s5 = inlined_call_operand.hbm [shape: bf16[32,128], index: 5, kind: output, shape index: {}]  }
   0x1   :  { %v343_v0 = vld [vmem:[%s458_s0 + $0x10] sm:$0xff]   ;;  %v344_v1 = vld [vmem:[%s458_s0 + $0x8] sm:$0xff]   ;;  %341 = vset.pattern.permute.xlu0 %v372_v2  ;;  %v346_v3 = vld [vmem:[%s459_s1] sm:$0xff]   ;;  %342 = vset.pattern.permute.xlu1 %v372_v2 }
   0x2   :  { %319 = vmatprep.subr.bf16.mxu0 %v343_v0  ;;  %v345_v4 = vld [vmem:[%s458_s0] sm:$0xff]   ;;  %325 = vmatprep.mubr.msk.bf16.mxu0 %vm84_vm0, %v346_v3  ;;  %v34_v5 = vld [vmem:[%s460_s2 + $0x10] sm:$0xff]  ;;  %v35_v7 = vld [vmem:[%s460_s2 + $0x18] sm:$0xff] }
   0x3   :  { %320 = vmatpush3.bf16.msra.mxu0 %v343_v0  ;;  %v32_v6 = vld [vmem:[%s460_s2] sm:$0xff]  ;;  %48 = vperm.xlu0 %341, %v34_v5   ;;  %v33_v8 = vld [vmem:[%s460_s2 + $0x8] sm:$0xff] }
   0x4   :  { %321 = vmatprep.subr.bf16.mxu0 %v344_v1  ;;  %38 = vperm.xlu1 %342, %v32_v6  }
   0x7   :  { %322 = vmatpush3.bf16.msra.mxu0 %v344_v1 }
   0x8   :  { %323 = vmatprep.subr.bf16.mxu0 %v345_v4 }
   0x9   :  { %10 = vsyncpa [#allocation3], 0  ;;  %v347_v9 = vld [vmem:[%s459_s1 + $0x8] sm:$0xff]   ;;  %53 = vperm.xlu0 %341, %v35_v7   ;;  %43 = vperm.xlu1 %342, %v33_v8   ;;  %v150_v10 = vld [vmem:[%s462_s4] sm:$0xff]  ;;  %vm184_vm1 = vcmask 261120   ;;  %s373_s19 = smov [#allocation2]  }
   0xa   :  { %v151_v11 = vld [vmem:[%s462_s4 + $0x8] sm:$0xff]  ;;  %v152_v12 = vld [vmem:[%s462_s4 + $0x10] sm:$0xff]  ;;  %v153_v13 = vld [vmem:[%s462_s4 + $0x18] sm:$0xff]  ;;  %s269_s20 = sshll.u32 %s373_s19, 4  ;;  %s270_s20 = int_to_ptr.vmem [resolvable:$true] %s269_s20 }
   0xb   :  { %324 = vmatpush3.bf16.msra.mxu0 %v345_v4  ;;  %v348_v14 = vld [vmem:[%s461_s3] sm:$0xff]   ;;  %v349_v33 = vld [vmem:[%s461_s3 + $0x8] sm:$0xff]   ;;  %s350_s3 = scalar_lea.vmem %s270_s20, 256  ;;  %p355_p1 = scmp.lt.s32.totalorder %s270_s20, %s270_s20 }
   0xc   :  { %333 = vmatprep.mubr.msk.bf16.mxu1 %vm184_vm1, %v348_v14  ;;  %p351_p0 = scmp.ne.s32.totalorder %s270_s20, %s350_s3  ;;  %p356_p2 = scmp.lt.s32.totalorder %s350_s3, %s350_s3 }
   0xd   :  { %156 = vperm.xlu0 %341, %v150_v10   ;;  %161 = vperm.xlu1 %342, %v151_v11  }
   0xe   :  { %326 = vmatmul.mubr.msk.bf16.vlgmr.msra.gmra.mxu0 %vm84_vm0, %v347_v9  ;;  %p357_p3 = por %p356_p2, %p355_p1 }
  0x10   :  { %p358_p4 = pnand %p357_p3, %p351_p0 }
  0x11   :  { %166 = vperm.xlu0 %341, %v152_v12   ;;  %171 = vperm.xlu1 %342, %v153_v13  }
  0x7e   :  { %v49_v15 = vpop.permute.xlu0 %48 }
  0x7f   :  { %v39_v16 = vpop.permute.xlu1 %38 }
  0x84   :  { %v54_v20 = vpop.permute.xlu0 %53  ;;  %v44_v24 = vpop.permute.xlu1 %43 }
  0x88   :  { %v157_v34 = vpop.permute.xlu0 %156  ;;  %v162_v35 = vpop.permute.xlu1 %161 }
  0x8c   :  { %v167_v37 = vpop.permute.xlu0 %166  ;;  %v172_v40 = vpop.permute.xlu1 %171 }
  0xce   :  { %v327_v17 = vpop.f32.mrf.mxu0 }
  0xcf   :  { %v134_v19 = vadd.f32 %v327_v17, %v49_v15 }
  0xd0   :  { %v125_v18 = vpop.f32.mrf.mxu0 }
  0xd1   :  { %v126_v22 = vadd.f32 %v125_v18, %v39_v16  ;;  %v142_v26 = vmax.f32 %v134_v19, 0.0 }
  0xd2   :  { %v328_v21 = vpop.f32.mrf.mxu0 }
  0xd3   :  { %v137_v23 = vadd.f32 %v328_v21, %v54_v20  ;;  %v140_v29 = vmax.f32 %v126_v22, 0.0 }
  0xd4   :  { %v128_v25 = vpop.f32.mrf.mxu0 }
  0xd5   :  { %v143_v27 = vmax.f32 %v137_v23, 0.0  ;;  %v129_v28 = vadd.f32 %v128_v25, %v44_v24 }
  0xd7   :  { %v141_v30 = vmax.f32 %v129_v28, 0.0  ;;  %v149_v31 = vpack.c.bf16 %v143_v27, %v142_v26 }
  0xd9   :  { %v148_v32 = vpack.c.bf16 %v141_v30, %v140_v29  ;;  %329 = vmatprep.subr.bf16.mxu1 %v149_v31 }
  0xda   :  { %330 = vmatpush3.bf16.msra.mxu1 %v149_v31 }
  0xdb   :  { %331 = vmatprep.subr.bf16.mxu1 %v148_v32 }
  0xde   :  { %332 = vmatpush3.bf16.msra.mxu1 %v148_v32 }
  0xe1   :  { %334 = vmatmul.mubr.msk.bf16.vlgmr.msra.gmra.mxu1 %vm184_vm1, %v349_v33 }
 0x1a1   :  { %v335_v36 = vpop.f32.mrf.mxu1 }
 0x1a2   :  { %v234_v39 = vadd.f32 %v335_v36, %v167_v37 }
 0x1a3   :  { %v225_v38 = vpop.f32.mrf.mxu1 }
 0x1a4   :  { %v226_v42 = vadd.f32 %v225_v38, %v157_v34  ;;  %v242_v45 = vmax.f32 %v234_v39, 0.0 }
 0x1a5   :  { %v336_v41 = vpop.f32.mrf.mxu1 }
 0x1a6   :  { %v237_v43 = vadd.f32 %v336_v41, %v172_v40  ;;  %v240_v48 = vmax.f32 %v226_v42, 0.0 }
 0x1a7   :  { %v228_v44 = vpop.f32.mrf.mxu1 }
 0x1a8   :  { %v243_v46 = vmax.f32 %v237_v43, 0.0  ;;  %v229_v47 = vadd.f32 %v228_v44, %v162_v35 }
 0x1aa   :  { %v307_v49 = vpack.c.bf16 %v243_v46, %v242_v45  ;;  %v241_v50 = vmax.f32 %v229_v47, 0.0 }
 0x1ac   :  { %309 = vst [vmem:[#allocation2 + $0x8] sm:$0xff] %v307_v49   ;;  %v302_v51 = vpack.c.bf16 %v241_v50, %v240_v48 }
 0x1ae   :  { %303 = vst [vmem:[#allocation2] sm:$0xff] %v302_v51  }
 0x1af   :  { %361 = shalt.err (!%p358_p4)
}
 0x1b0   :  { %s374_s21 = smov 64   ;;  %s375_s22 = smov 4  }
 0x1b1   :  { %275 = dma.vmem_to_hbm [thread:$0]  %s270_s20, 256, %s463_s5, [#allocation3], %s374_s21, %s374_s21, %s375_s22  }
 0x1b2   :  { %370 = dma.done.wait [#allocation3], 256  }
 0x1b3   :  { %371 = vsyncadd [#allocation3], 4294967040 }
 0x1b4   :  { %279 = vsyncpa [#allocation3], 1 }

</bundles_post_ra>
